<compile_context>
chip_gen: v7x
topology: tpu7x:2x2x1
jax: 0.10.0
libtpu: 0.0.40
codegen_flags: <defaults>
</compile_context>

<pallas_src>
import jax
import jax.numpy as jnp
import numpy as np
from jax.experimental import pallas as pl
from jax.experimental.pallas import tpu as pltpu

LANE = 128  # lane width; batch tiles are multiples of this (unless tile_b == B)


def mlp_kernel_t(x_ref, w1_ref, b1_ref, w2_ref, b2_ref, o_ref):
    """Transposed MLP tile.

    x_ref : (d_in, tile_b)   f32   batch on lanes
    w1_ref: (H, d_in)        f32   fc1.weight
    b1_ref: (H, 1)           f32   fc1.bias
    w2_ref: (d_out, H)       f32   fc2.weight
    b2_ref: (d_out, 1)       f32   fc2.bias
    o_ref : (d_out, tile_b)  f32
    """
    x = x_ref[...]                       # (d_in, tile_b)
    w1 = w1_ref[...]                     # (H, d_in)
    d_in = x.shape[0]

    # fc1 as VPU broadcast FMAs over the tiny K = d_in contraction (skip MXU).
    acc = w1[:, 0:1] * x[0:1, :]         # (H, tile_b)
    for k in range(1, d_in):             # static unroll, d_in = 3
        acc = acc + w1[:, k:k + 1] * x[k:k + 1, :]
    h = jnp.maximum(acc + b1_ref[...], 0.0)

    # fc2 on the MXU: (d_out, H) @ (H, tile_b) -> lane-dense output tile.
    out = jnp.dot(w2_ref[...], h, preferred_element_type=jnp.float32)
    o_ref[...] = out + b2_ref[...]


def _pick_tile_b(B):
    """Batch tile: one tile for small B, else a 128-multiple giving >= ~8 steps."""
    if B <= 512:
        return B                                  # block == full dim -> always legal
    t = min(4096, pl.cdiv(B, 8))                  # >= ~8 grid steps, capped at 4096
    return max(LANE, (t // LANE) * LANE)          # multiple of 128 (lane axis)


def policy_network_forward_t(x_t, w1, b1, w2, b2, tile_b=None):
    """Core kernel entry. x_t: (d_in, B) -> out_t: (d_out, B)."""
    d_in, B = x_t.shape
    H = w1.shape[0]
    d_out = w2.shape[0]

    if tile_b is None:
        tile_b = _pick_tile_b(B)

    n_tiles = pl.cdiv(B, tile_b)
    B_pad = n_tiles * tile_b
    if B_pad != B:
        x_t = jnp.pad(x_t, ((0, 0), (0, B_pad - B)))

    out_t = pl.pallas_call(
        mlp_kernel_t,
        out_shape=jax.ShapeDtypeStruct((d_out, B_pad), jnp.float32),
        grid_spec=pltpu.PrefetchScalarGridSpec(
            num_scalar_prefetch=0,
            grid=(n_tiles,),
            in_specs=[
                pl.BlockSpec((d_in, tile_b), lambda i: (0, i)),  # x^T: tiled over B
                pl.BlockSpec((H, d_in), lambda i: (0, 0)),       # w1: VMEM-resident
                pl.BlockSpec((H, 1), lambda i: (0, 0)),          # b1: VMEM-resident
                pl.BlockSpec((d_out, H), lambda i: (0, 0)),      # w2: VMEM-resident
                pl.BlockSpec((d_out, 1), lambda i: (0, 0)),      # b2: VMEM-resident
            ],
            out_specs=pl.BlockSpec((d_out, tile_b), lambda i: (0, i)),
        ),
        compiler_params=pltpu.CompilerParams(
            dimension_semantics=("parallel",)),  # v7x megacore sharding; no-op v5e/v6e
    )(x_t, w1, b1, w2, b2)

    return out_t[:, :B] if B_pad != B else out_t


def policy_network_forward(x, w1, b1, w2, b2, tile_b=None):
    """Module-shaped convenience wrapper: x (B, d_in) -> (B, d_out).

    For peak bandwidth at very large B, feed `policy_network_forward_t` with
    x already stored as (d_in, B) and consume the (d_out, B) output directly;
    the transposes here only touch ~20 B per batch row.
    """
    out_t = policy_network_forward_t(x.T, w1, b1, w2, b2, tile_b)
    return out_t.T


def xavier_uniform(key, shape):
    # shape = (fan_out, fan_in), as torch nn.Linear.weight
    fan_out, fan_in = shape
    bound = float(np.sqrt(6.0 / (fan_in + fan_out)))
    return jax.random.uniform(key, shape, jnp.float32, -bound, bound)


def init_params(key, input_dim=3, hidden_dim=64, output_dim=2):
    k1, k2 = jax.random.split(key)
    w1 = xavier_uniform(k1, (hidden_dim, input_dim))    # fc1.weight (H, d_in)
    b1 = jnp.zeros((hidden_dim, 1), jnp.float32)        # fc1.bias  (H, 1)
    w2 = xavier_uniform(k2, (output_dim, hidden_dim))   # fc2.weight (d_out, H)
    b2 = jnp.zeros((output_dim, 1), jnp.float32)        # fc2.bias  (d_out, 1)
    return w1, b1, w2, b2


def _reference(x, w1, b1, w2, b2):
    x = np.asarray(x); w1 = np.asarray(w1); b1 = np.asarray(b1)
    w2 = np.asarray(w2); b2 = np.asarray(b2)
    h = np.maximum(x @ w1.T + b1.T, 0.0)
    return h @ w2.T + b2.T


if __name__ == "__main__":
    key = jax.random.PRNGKey(0)
    kx, kp, kx2 = jax.random.split(key, 3)

    D_IN, H, D_OUT = 3, 64, 2
    w1, b1, w2, b2 = init_params(kp, D_IN, H, D_OUT)

    # Small demo batch (module-shaped (B, d_in) input).
    B = 8
    x = jax.random.normal(kx, (B, D_IN), jnp.float32)
    out = jax.block_until_ready(policy_network_forward(x, w1, b1, w2, b2))
    assert out.shape == (B, D_OUT)
    np.testing.assert_allclose(np.asarray(out), _reference(x, w1, b1, w2, b2),
                               rtol=1e-4, atol=1e-4)

    # Larger batch exercising the tiled + padded path (B not a multiple of 128).
    B2 = 1000
    x2 = jax.random.normal(kx2, (B2, D_IN), jnp.float32)
    out2 = jax.block_until_ready(policy_network_forward(x2, w1, b1, w2, b2))
    assert out2.shape == (B2, D_OUT)
    np.testing.assert_allclose(np.asarray(out2), _reference(x2, w1, b1, w2, b2),
                               rtol=1e-4, atol=1e-4)

    print("KERNEL_OK")
</pallas_src>

<mosaic_0001>
module attributes {stable_mosaic.version = 11 : i64} {
  func.func @mlp_kernel_t(%arg0: i32, %arg1: memref<3x8xf32, #tpu.memory_space<vmem>>, %arg2: memref<64x3xf32, #tpu.memory_space<vmem>>, %arg3: memref<64x1xf32, #tpu.memory_space<vmem>>, %arg4: memref<2x64xf32, #tpu.memory_space<vmem>>, %arg5: memref<2x1xf32, #tpu.memory_space<vmem>>, %arg6: memref<2x8xf32, #tpu.memory_space<vmem>>) attributes {dimension_semantics = [#tpu.dimension_semantics<parallel>], iteration_bounds = array<i64: 1>, scalar_prefetch = 0 : i64, scratch_operands = 0 : i64, tpu.core_type = #tpu.core_type<tc>, window_params = [{transform_indices = @transform_0, window_bounds = array<i64: 3, 8>}, {pipeline_mode = #tpu.pipeline_mode<synchronous>, transform_indices = @transform_1, window_bounds = array<i64: 64, 3>}, {pipeline_mode = #tpu.pipeline_mode<synchronous>, transform_indices = @transform_2, window_bounds = array<i64: 64, 1>}, {pipeline_mode = #tpu.pipeline_mode<synchronous>, transform_indices = @transform_3, window_bounds = array<i64: 2, 64>}, {pipeline_mode = #tpu.pipeline_mode<synchronous>, transform_indices = @transform_4, window_bounds = array<i64: 2, 1>}, {transform_indices = @transform_5, window_bounds = array<i64: 2, 8>}]} {
    %c0 = arith.constant 0 : index
    %c0_0 = arith.constant 0 : index
    %0 = vector.load %arg1[%c0, %c0_0] : memref<3x8xf32, #tpu.memory_space<vmem>>, vector<3x8xf32>
    %c0_1 = arith.constant 0 : index
    %c0_2 = arith.constant 0 : index
    %1 = vector.load %arg2[%c0_1, %c0_2] : memref<64x3xf32, #tpu.memory_space<vmem>>, vector<64x3xf32>
    %2 = vector.extract_strided_slice %1 {offsets = [0, 0], sizes = [64, 1], strides = [1, 1]} : vector<64x3xf32> to vector<64x1xf32>
    %3 = vector.extract_strided_slice %0 {offsets = [0, 0], sizes = [1, 8], strides = [1, 1]} : vector<3x8xf32> to vector<1x8xf32>
    %4 = vector.broadcast %2 : vector<64x1xf32> to vector<64x8xf32>
    %5 = vector.broadcast %3 : vector<1x8xf32> to vector<64x8xf32>
    %6 = arith.mulf %4, %5 : vector<64x8xf32>
    %7 = vector.extract_strided_slice %1 {offsets = [0, 1], sizes = [64, 1], strides = [1, 1]} : vector<64x3xf32> to vector<64x1xf32>
    %8 = vector.extract_strided_slice %0 {offsets = [1, 0], sizes = [1, 8], strides = [1, 1]} : vector<3x8xf32> to vector<1x8xf32>
    %9 = vector.broadcast %7 : vector<64x1xf32> to vector<64x8xf32>
    %10 = vector.broadcast %8 : vector<1x8xf32> to vector<64x8xf32>
    %11 = arith.mulf %9, %10 : vector<64x8xf32>
    %12 = arith.addf %6, %11 : vector<64x8xf32>
    %13 = vector.extract_strided_slice %1 {offsets = [0, 2], sizes = [64, 1], strides = [1, 1]} : vector<64x3xf32> to vector<64x1xf32>
    %14 = vector.extract_strided_slice %0 {offsets = [2, 0], sizes = [1, 8], strides = [1, 1]} : vector<3x8xf32> to vector<1x8xf32>
    %15 = vector.broadcast %13 : vector<64x1xf32> to vector<64x8xf32>
    %16 = vector.broadcast %14 : vector<1x8xf32> to vector<64x8xf32>
    %17 = arith.mulf %15, %16 : vector<64x8xf32>
    %18 = arith.addf %12, %17 : vector<64x8xf32>
    %c0_3 = arith.constant 0 : index
    %c0_4 = arith.constant 0 : index
    %19 = vector.load %arg3[%c0_3, %c0_4] : memref<64x1xf32, #tpu.memory_space<vmem>>, vector<64x1xf32>
    %20 = vector.broadcast %19 : vector<64x1xf32> to vector<64x8xf32>
    %21 = arith.addf %18, %20 : vector<64x8xf32>
    %cst = arith.constant 0.000000e+00 : f32
    %22 = vector.broadcast %cst : f32 to vector<64x8xf32>
    %23 = arith.maximumf %21, %22 : vector<64x8xf32>
    %c0_5 = arith.constant 0 : index
    %c0_6 = arith.constant 0 : index
    %24 = vector.load %arg4[%c0_5, %c0_6] : memref<2x64xf32, #tpu.memory_space<vmem>>, vector<2x64xf32>
    %cst_7 = arith.constant dense<0.000000e+00> : vector<2x8xf32>
    %25 = tpu.matmul %24, %23, %cst_7 {dimension_numbers = #tpu.dot_dimension_numbers<[1], [0], [0], [1], [0, 0, 1, 1], [], []>} : vector<2x64xf32>, vector<64x8xf32>, vector<2x8xf32> -> vector<2x8xf32>
    %c0_8 = arith.constant 0 : index
    %c0_9 = arith.constant 0 : index
    %26 = vector.load %arg5[%c0_8, %c0_9] : memref<2x1xf32, #tpu.memory_space<vmem>>, vector<2x1xf32>
    %27 = vector.broadcast %26 : vector<2x1xf32> to vector<2x8xf32>
    %28 = arith.addf %25, %27 : vector<2x8xf32>
    %c0_10 = arith.constant 0 : index
    %c0_11 = arith.constant 0 : index
    %29 = vector.load %arg6[%c0_10, %c0_11] : memref<2x8xf32, #tpu.memory_space<vmem>>, vector<2x8xf32>
    tpu.vector_store %arg6[%c0_10, %c0_11], %28 {strides = array<i32>} : memref<2x8xf32, #tpu.memory_space<vmem>>, vector<2x8xf32>,
    return
  }
  func.func @transform_0(%arg0: i32) -> (i32, i32) {
    %c0_i32 = arith.constant 0 : i32
    %c0_i32_0 = arith.constant 0 : i32
    return %c0_i32, %arg0 : i32, i32
  }
  func.func @transform_1(%arg0: i32) -> (i32, i32) {
    %c0_i32 = arith.constant 0 : i32
    %c0_i32_0 = arith.constant 0 : i32
    %c0_i32_1 = arith.constant 0 : i32
    return %c0_i32, %c0_i32_0 : i32, i32
  }
  func.func @transform_2(%arg0: i32) -> (i32, i32) {
    %c0_i32 = arith.constant 0 : i32
    %c0_i32_0 = arith.constant 0 : i32
    %c0_i32_1 = arith.constant 0 : i32
    return %c0_i32, %c0_i32_0 : i32, i32
  }
  func.func @transform_3(%arg0: i32) -> (i32, i32) {
    %c0_i32 = arith.constant 0 : i32
    %c0_i32_0 = arith.constant 0 : i32
    %c0_i32_1 = arith.constant 0 : i32
    return %c0_i32, %c0_i32_0 : i32, i32
  }
  func.func @transform_4(%arg0: i32) -> (i32, i32) {
    %c0_i32 = arith.constant 0 : i32
    %c0_i32_0 = arith.constant 0 : i32
    %c0_i32_1 = arith.constant 0 : i32
    return %c0_i32, %c0_i32_0 : i32, i32
  }
  func.func @transform_5(%arg0: i32) -> (i32, i32) {
    %c0_i32 = arith.constant 0 : i32
    %c0_i32_0 = arith.constant 0 : i32
    return %c0_i32, %arg0 : i32, i32
  }
}

</mosaic_0001>

<bundles_post_ra>
// kernel: tpu_custom_call.1
= control target key start
LH: loop header
LB: loop body
LE: loop exit
PB: predicated region body
PF: predicated region fallthrough
CT: control target
= control target key end

     0   :  { %v434_v1 = vmov 2   ;;  %v435_v2 = vmov 1   ;;  %s580_s0 = inlined_call_operand.vmem [shape: f32[3,8], index: 0, kind: input, shape index: {}]   ;;  %s581_s1 = inlined_call_operand.vmem [shape: f32[64,3], index: 1, kind: input, shape index: {}]   ;;  %s582_s2 = inlined_call_operand.vmem [shape: f32[64,1], index: 2, kind: input, shape index: {}]   ;;  %s583_s3 = inlined_call_operand.vmem [shape: f32[2,64], index: 3, kind: input, shape index: {}]   ;;  %s584_s4 = inlined_call_operand.vmem [shape: f32[2,1], index: 4, kind: input, shape index: {}]   ;;  %s585_s5 = inlined_call_operand.hbm [shape: f32[2,8], index: 5, kind: output, shape index: {}]  }
   0x1   :  { %v22_v0 = vld [vmem:[%s581_s1] sm:$0xff]  ;;  %396 = vset.pattern.permute.xlu0 %v434_v1  ;;  %395 = vset.pattern.permute.xlu1 %v435_v2  ;;  %v24_v3 = vld [vmem:[%s581_s1 + $0x10] sm:$0xff]  ;;  %v23_v4 = vld [vmem:[%s581_s1 + $0x8] sm:$0xff] }
   0x2   :  { %135 = vperm.xlu0 %396, %v22_v0   ;;  %83 = vperm.xlu1 %395, %v22_v0  }
   0x6   :  { %143 = vperm.xlu0 %396, %v24_v3   ;;  %87 = vperm.xlu1 %395, %v23_v4  }
   0x7   :  { %10 = vsyncpa [#allocation3], 0  ;;  %v27_v5 = vld [vmem:[%s581_s1 + $0x28] sm:$0xff]  ;;  %v26_v6 = vld [vmem:[%s581_s1 + $0x20] sm:$0xff]  ;;  %v436_v7 = vmov 0   ;;  %v437_v14 = vmov 0.0|0.0   ;;  %v70_v28 = vlaneseq }
   0x8   :  { %v29_v8 = vld [vmem:[%s581_s1 + $0x38] sm:$0xff]  ;;  %v186_v10 = vld [vmem:[%s582_s2] sm:$0xff]  ;;  %v187_v11 = vld [vmem:[%s582_s2 + $0x8] sm:$0xff]  ;;  %376 = vmatprep.subr.bf16.mxu0 %v437_v14  ;;  %vm438_vm0 = vmmov 0   ;;  %v439_v21 = vmov 0.0   ;;  %vm257_vm1 = vcmask 523264  }
   0x9   :  { %v25_v9 = vld [vmem:[%s581_s1 + $0x18] sm:$0xff]  ;;  %v28_v12 = vld [vmem:[%s581_s1 + $0x30] sm:$0xff]  ;;  %v190_v13 = vld [vmem:[%s582_s2 + $0x20] sm:$0xff]  ;;  %373 = vmatprep.mubr.msk.f32.mxu0 %vm438_vm0, %v439_v21  ;;  %v71_v30 = vshrl.u32 %v70_v28, 7  ;;  %s440_s27 = smov [#allocation2]   ;;  %vm331_vm2 = vcmask 58368  }
   0xa   :  { %155 = vperm.xlu0 %396, %v27_v5   ;;  %397 = vset.pattern.permute.xlu1 %v434_v1  ;;  %v193_v15 = vld [vmem:[%s582_s2 + $0x38] sm:$0xff]  ;;  %v188_v16 = vld [vmem:[%s582_s2 + $0x10] sm:$0xff]  ;;  %v191_v18 = vld [vmem:[%s582_s2 + $0x28] sm:$0xff]  ;;  %s339_s28 = sshll.u32 %s440_s27, 4  ;;  %s340_s28 = int_to_ptr.vmem [resolvable:$true] %s339_s28 }
   0xb   :  { %139 = vperm.xlu1 %397, %v23_v4   ;;  %v189_v17 = vld [vmem:[%s582_s2 + $0x18] sm:$0xff]  ;;  %v192_v19 = vld [vmem:[%s582_s2 + $0x30] sm:$0xff]  ;;  %v251_v20 = vld [vmem:[%s584_s4] sm:$0x3]  ;;  %v116_v33 = vsub.s32 1, %v71_v30  ;;  %v72_v34 = vsub.s32 0, %v71_v30  ;;  %p415_p1 = scmp.lt.s32.totalorder %s340_s28, %s340_s28 }
   0xc   :  { %v21_v35 = vld [vmem:[%s580_s0] sm:$0x7]  ;;  %v168_v38 = vsub.s32 2, %v71_v30  ;;  %s410_s29 = scalar_lea.vmem %s340_s28, 32 }
   0xd   :  { %v530_v37 = vrot.slane %v21_v35, %v116_v33  ;;  %v532_v39 = vrot.slane %v21_v35, %v72_v34  ;;  %p411_p0 = scmp.ne.s32.totalorder %s340_s28, %s410_s29  ;;  %p416_p2 = scmp.lt.s32.totalorder %s410_s29, %s410_s29 }
   0xe   :  { %404 = vset.pattern.permute.xlu0 %v435_v2  ;;  %v536_v44 = vrot.slane %v21_v35, %v168_v38 }
   0xf   :  { %99 = vperm.xlu0 %404, %v26_v6   ;;  %398 = vset.pattern.permute.xlu1 %v436_v7  ;;  %p417_p3 = por %p416_p2, %p415_p1 }
  0x10   :  { %42 = vperm.xlu1 %398, %v24_v3  }
  0x11   :  { %p418_p4 = pnand %p417_p3, %p411_p0 }
  0x13   :  { %111 = vperm.xlu0 %404, %v29_v8  }
  0x14   :  { %399 = vset.pattern.permute.xlu1 %v435_v2 }
  0x15   :  { %91 = vperm.xlu1 %399, %v24_v3  }
  0x17   :  { %407 = vset.pattern.permute.xlu0 %v436_v7 }
  0x18   :  { %32 = vperm.xlu0 %407, %v22_v0  }
  0x19   :  { %95 = vperm.xlu1 %399, %v25_v9  }
  0x1c   :  { %37 = vperm.xlu0 %407, %v23_v4  }
  0x1d   :  { %400 = vset.pattern.permute.xlu1 %v434_v1 }
  0x1e   :  { %147 = vperm.xlu1 %400, %v25_v9  }
  0x20   :  { %47 = vperm.xlu0 %407, %v25_v9  }
  0x22   :  { %401 = vset.pattern.permute.xlu1 %v436_v7 }
  0x23   :  { %196 = vperm.xlu1 %401, %v186_v10  }
  0x24   :  { %201 = vperm.xlu0 %407, %v187_v11  }
  0x27   :  { %52 = vperm.xlu1 %401, %v26_v6  }
  0x28   :  { %62 = vperm.xlu0 %407, %v28_v12  }
  0x2b   :  { %57 = vperm.xlu1 %401, %v27_v5  }
  0x2c   :  { %216 = vperm.xlu0 %407, %v190_v13  }
  0x2f   :  { %402 = vset.pattern.permute.xlu1 %v435_v2 }
  0x30   :  { %103 = vperm.xlu1 %402, %v27_v5   ;;  %231 = vperm.xlu0 %407, %v193_v15  }
  0x34   :  { %403 = vset.pattern.permute.xlu1 %v434_v1 }
  0x35   :  { %151 = vperm.xlu1 %403, %v26_v6  }
  0x39   :  { %405 = vset.pattern.permute.xlu1 %v436_v7 }
  0x3a   :  { %206 = vperm.xlu1 %405, %v188_v16  }
  0x3e   :  { %211 = vperm.xlu1 %405, %v189_v17  }
  0x42   :  { %67 = vperm.xlu1 %405, %v29_v8  }
  0x46   :  { %406 = vset.pattern.permute.xlu1 %v435_v2 }
  0x47   :  { %107 = vperm.xlu1 %406, %v28_v12  }
  0x4b   :  { %408 = vset.pattern.permute.xlu1 %v434_v1 }
  0x4c   :  { %159 = vperm.xlu1 %408, %v28_v12  }
  0x50   :  { %163 = vperm.xlu1 %408, %v29_v8  }
  0x54   :  { %409 = vset.pattern.permute.xlu1 %v436_v7 }
  0x55   :  { %221 = vperm.xlu1 %409, %v191_v18  }
  0x59   :  { %226 = vperm.xlu1 %409, %v192_v19  }
  0x5d   :  { %254 = vperm.xlu1 %409, %v251_v20  }
  0x81   :  { %v84_v22 = vpop.permute.xlu1 %83  ;;  %v136_v23 = vpop.permute.xlu0 %135 }
  0x82   :  { %v118_v43 = vmul.f32 %v530_v37, %v84_v22  ;;  %v170_v48 = vmul.f32 %v536_v44, %v136_v23 }
  0x85   :  { %v88_v24 = vpop.permute.xlu1 %87  ;;  %v144_v25 = vpop.permute.xlu0 %143 }
  0x86   :  { %v119_v46 = vmul.f32 %v530_v37, %v88_v24  ;;  %v172_v6 = vmul.f32 %v536_v44, %v144_v25 }
  0x89   :  { %v523_v26 = vpop.permute.xlu0 %155 }
  0x8a   :  { %v140_v27 = vpop.permute.xlu1 %139 }
  0x8b   :  { %v171_v53 = vmul.f32 %v536_v44, %v140_v27 }
  0x8e   :  { %v100_v29 = vpop.permute.xlu0 %99 }
  0x8f   :  { %v43_v31 = vpop.permute.xlu1 %42  ;;  %v122_v23 = vmul.f32 %v530_v37, %v100_v29 }
  0x90   :  { %v76_v3 = vmul.f32 %v532_v39, %v43_v31 }
  0x92   :  { %v525_v32 = vpop.permute.xlu0 %111 }
  0x93   :  { %v125_v35 = vmul.f32 %v530_v37, %v525_v32 }
  0x94   :  { %v92_v36 = vpop.permute.xlu1 %91 }
  0x95   :  { %v120_v2 = vmul.f32 %v530_v37, %v92_v36 }
  0x97   :  { %v33_v40 = vpop.permute.xlu0 %32  ;;  %v128_v7 = vadd.f32 %v120_v2, %v76_v3 }
  0x98   :  { %v96_v41 = vpop.permute.xlu1 %95  ;;  %v74_v42 = vmul.f32 %v532_v39, %v33_v40 }
  0x99   :  { %v121_v8 = vmul.f32 %v530_v37, %v96_v41  ;;  %v180_v12 = vadd.f32 %v172_v6, %v128_v7 }
  0x9a   :  { %v126_v49 = vadd.f32 %v118_v43, %v74_v42  ;;  %v175_v42 = vmul.f32 %v536_v44, %v523_v26 }
  0x9b   :  { %v38_v45 = vpop.permute.xlu0 %37 }
  0x9c   :  { %v75_v47 = vmul.f32 %v532_v39, %v38_v45  ;;  %v178_v54 = vadd.f32 %v170_v48, %v126_v49 }
  0x9d   :  { %v148_v50 = vpop.permute.xlu1 %147 }
  0x9e   :  { %v127_v51 = vadd.f32 %v119_v46, %v75_v47  ;;  %v173_v11 = vmul.f32 %v536_v44, %v148_v50 }
  0x9f   :  { %v48_v52 = vpop.permute.xlu0 %47 }
  0xa0   :  { %v179_v56 = vadd.f32 %v171_v53, %v127_v51  ;;  %v77_v4 = vmul.f32 %v532_v39, %v48_v52 }
  0xa2   :  { %v197_v55 = vpop.permute.xlu1 %196  ;;  %v129_v9 = vadd.f32 %v121_v8, %v77_v4 }
  0xa3   :  { %v234_v57 = vadd.f32 %v197_v55, %v178_v54  ;;  %v202_v58 = vpop.permute.xlu0 %201 }
  0xa4   :  { %v235_v59 = vadd.f32 %v202_v58, %v179_v56  ;;  %v181_v15 = vadd.f32 %v173_v11, %v129_v9 }
  0xa5   :  { %v242_v60 = vmax.f32 %v234_v57, 0.0 }
  0xa6   :  { %v243_v61 = vmax.f32 %v235_v59, 0.0  ;;  %v53_v62 = vpop.permute.xlu1 %52 }
  0xa7   :  { %v78_v24 = vmul.f32 %v532_v39, %v53_v62  ;;  %v63_v25 = vpop.permute.xlu0 %62 }
  0xa8   :  { %v377_v63 = vpack.c.bf16 %v243_v61, %v242_v60  ;;  %v80_v46 = vmul.f32 %v532_v39, %v63_v25 }
  0xa9   :  { %v130_v31 = vadd.f32 %v122_v23, %v78_v24 }
  0xaa   :  { %v58_v0 = vpop.permute.xlu1 %57  ;;  %378 = vmatpush3.bf16.msra.mxu0 %v377_v63 }
  0xab   :  { %379 = vmatprep.subr.bf16.mxu0 %v437_v14  ;;  %v79_v33 = vmul.f32 %v532_v39, %v58_v0  ;;  %v217_v29 = vpop.permute.xlu0 %216 }
  0xaf   :  { %v104_v1 = vpop.permute.xlu1 %103  ;;  %v232_v53 = vpop.permute.xlu0 %231 }
  0xb0   :  { %v123_v27 = vmul.f32 %v530_v37, %v104_v1 }
  0xb2   :  { %v131_v36 = vadd.f32 %v123_v27, %v79_v33 }
  0xb4   :  { %v152_v5 = vpop.permute.xlu1 %151  ;;  %v183_v50 = vadd.f32 %v175_v42, %v131_v36 }
  0xb5   :  { %v174_v28 = vmul.f32 %v536_v44, %v152_v5 }
  0xb7   :  { %v182_v38 = vadd.f32 %v174_v28, %v130_v31 }
  0xb9   :  { %v207_v10 = vpop.permute.xlu1 %206  ;;  %v238_v47 = vadd.f32 %v217_v29, %v182_v38 }
  0xba   :  { %v236_v13 = vadd.f32 %v207_v10, %v180_v12 }
  0xbb   :  { %v246_v54 = vmax.f32 %v238_v47, 0.0 }
  0xbc   :  { %v244_v18 = vmax.f32 %v236_v13, 0.0 }
  0xbd   :  { %v212_v16 = vpop.permute.xlu1 %211 }
  0xbe   :  { %v237_v17 = vadd.f32 %v212_v16, %v181_v15 }
  0xc0   :  { %v245_v19 = vmax.f32 %v237_v17, 0.0 }
  0xc1   :  { %v68_v20 = vpop.permute.xlu1 %67 }
  0xc2   :  { %v380_v21 = vpack.c.bf16 %v245_v19, %v244_v18  ;;  %v81_v34 = vmul.f32 %v532_v39, %v68_v20 }
  0xc4   :  { %381 = vmatpush3.bf16.msra.mxu0 %v380_v21  ;;  %v133_v43 = vadd.f32 %v125_v35, %v81_v34 }
  0xc5   :  { %382 = vmatprep.subr.bf16.mxu0 %v437_v14 }
  0xc6   :  { %v108_v22 = vpop.permute.xlu1 %107 }
  0xc7   :  { %v124_v45 = vmul.f32 %v530_v37, %v108_v22 }
  0xc9   :  { %v132_v51 = vadd.f32 %v124_v45, %v80_v46 }
  0xcb   :  { %v160_v30 = vpop.permute.xlu1 %159 }
  0xcc   :  { %v176_v48 = vmul.f32 %v536_v44, %v160_v30 }
  0xce   :  { %v184_v57 = vadd.f32 %v176_v48, %v132_v51 }
  0xcf   :  { %v164_v40 = vpop.permute.xlu1 %163 }
  0xd0   :  { %v177_v41 = vmul.f32 %v536_v44, %v164_v40  ;;  %v250_v44 = vld [vmem:[%s583_s3] sm:$0x3] }
  0xd2   :  { %v185_v49 = vadd.f32 %v177_v41, %v133_v43 }
  0xd4   :  { %v222_v32 = vpop.permute.xlu1 %221  ;;  %v241_v55 = vadd.f32 %v232_v53, %v185_v49 }
  0xd5   :  { %v239_v52 = vadd.f32 %v222_v32, %v183_v50 }
  0xd6   :  { %v249_v37 = vmax.f32 %v241_v55, 0.0 }
  0xd7   :  { %v247_v56 = vmax.f32 %v239_v52, 0.0 }
  0xd8   :  { %v227_v58 = vpop.permute.xlu1 %226 }
  0xd9   :  { %v383_v26 = vpack.c.bf16 %v247_v56, %v246_v54  ;;  %v240_v59 = vadd.f32 %v227_v58, %v184_v57 }
  0xdb   :  { %v248_v60 = vmax.f32 %v240_v59, 0.0  ;;  %384 = vmatpush3.bf16.msra.mxu0 %v383_v26 }
  0xdc   :  { %385 = vmatprep.subr.bf16.mxu0 %v437_v14  ;;  %v255_v61 = vpop.permute.xlu1 %254 }
  0xdd   :  { %v386_v39 = vpack.c.bf16 %v249_v37, %v248_v60 }
  0xdf   :  { %387 = vmatpush3.bf16.msra.mxu0 %v386_v39 }
  0xe2   :  { %374 = vmatmul.mubr.msk.f32.vlgmr.msra.gmra.mrb[0].mxu0 %vm257_vm1, %v250_v44 }
 0x1b5   :  { %v327_v62 = vpop.f32.mrb[0].mxu0 }
 0x1b6   :  { %v328_v63 = vadd.f32 %v327_v62, %v255_v61  ;;  %v375_v0 = vpop.f32.mrb[1].mxu0 }
 0x1b8   :  { %332 = vst.msk [vmem:[#allocation2] sm:$0x3] %vm331_vm2, %v328_v63 }
 0x1b9   :  { %421 = shalt.err (!%p418_p4)
}
 0x1ba   :  { %s422_s6 = scalar_lea.hbm %s585_s5, 32 }
 0x1bb   :  { %p423_p5 = scmp.ne.s32.totalorder %s585_s5, %s422_s6  ;;  %p426_p6 = scmp.lt.u32.totalorder %s422_s6, %s585_s5 }
 0x1bd   :  { %p428_p7 = pnand %p426_p6, %p423_p5 }
 0x1bf   :  { %431 = shalt.err (!%p428_p7)
}
 0x1c0   :  { %342 = dma.vmem_to_hbm [thread:$0]  %s340_s28, 32, %s585_s5, [#allocation3]  }
 0x1c1   :  { %432 = dma.done.wait [#allocation3], 32  }
 0x1c2   :  { %433 = vsyncadd [#allocation3], 4294967264 }
 0x1c3   :  { %346 = vsyncpa [#allocation3], 1 }

</bundles_post_ra>
